<compile_context>
chip_gen: v5e
topology: v5e:2x2
jax: 0.10.0
libtpu: 0.0.40
codegen_flags: <defaults>
</compile_context>

<pallas_src>
import math
from functools import partial

import jax
import jax.numpy as jnp
import numpy as np
from jax.experimental import pallas as pl
from jax.experimental.pallas import tpu as pltpu

_LANE = 128  # lane width (last-dim vreg extent)


def _round_up(x: int, m: int) -> int:
    return ((x + m - 1) // m) * m


def gaussian_taps(kernel_size: int, sigma: float) -> np.ndarray:
    """1-D gaussian taps, shape (K,), matching GaussianSmoothing.__init__ (dim=1)."""
    idx = np.arange(kernel_size, dtype=np.float32)
    mean = (kernel_size - 1) / 2.0
    g = (1.0 / (sigma * math.sqrt(2.0 * math.pi))) * np.exp(
        -(((idx - mean) / sigma) ** 2) / 2.0
    )
    g = g / g.sum()
    return g.astype(np.float32)


def _smooth_rows_kernel(x_ref, o_ref, *, taps, l_out, use_roll):
    """Depthwise 1-D conv over a row block.

    x_ref: (TR, L)      VMEM — input rows (no halo padding needed)
    o_ref: (TR, L_out)  VMEM — output rows at natural width
    taps:  tuple of Python floats (scalar immediates)
    """
    # Load the tile ONCE, cast to f32 ONCE; shifted views are derived in-register.
    x = x_ref[...].astype(jnp.float32)          # (TR, L)
    l_in = x.shape[-1]

    def shifted(k):
        if k == 0:
            return x[:, :l_out]
        if use_roll:
            # Left-rotate by k (shift = L - k): out[j] = x[(j + k) mod L].
            # Wrapped lanes only land at j >= l_out and are sliced away.
            return pltpu.roll(x, shift=l_in - k, axis=-1)[:, :l_out]
        # Unaligned / short rows: static lane-offset slice of the loaded value
        # (still a single VMEM load; the shift happens on vregs).
        return x[:, k:k + l_out]

    # Initialize the accumulator with tap 0 (saves a full-tile zero pass).
    acc = shifted(0) * taps[0]
    for k in range(1, len(taps)):
        acc = acc + shifted(k) * taps[k]
    o_ref[...] = acc.astype(o_ref.dtype)


def _vmem_plan():
    """(block_budget_bytes, vmem_limit_bytes, row_cap) tuned per TPU generation."""
    cap = None
    try:
        cap = int(pltpu.get_tpu_info().vmem_capacity_bytes)
    except Exception:
        cap = None
    if cap is not None and cap >= 128 * 1024 * 1024:
        # v5e / v6e: 128 MiB physical VMEM — go big, amortize per-step overhead.
        return 40 * 1024 * 1024, 96 * 1024 * 1024, 2048
    # v7x (64 MiB per TensorCore) or unknown: stay conservative.
    return 20 * 1024 * 1024, 48 * 1024 * 1024, 1024


def gaussian_smoothing_1d(x: jnp.ndarray, taps) -> jnp.ndarray:
    """Depthwise (groups=C) 1-D convolution, 'valid' padding, stride 1.

    x: (N, C, L), taps: concrete (K,) gaussian  ->  (N, C, L - K + 1)
    """
    taps = np.asarray(taps, dtype=np.float32)
    n, c, l = x.shape
    k = int(taps.shape[0])
    l_out = l - k + 1
    assert l_out >= 1, "kernel_size larger than input length"

    # ---- Collapse batch & channels into rows (free, contiguous reshape). ----
    r = n * c
    xr = x.reshape(r, l)

    itemsize = jnp.dtype(x.dtype).itemsize
    # dtype-aware sublane packing: f32 -> 8 rows, bf16 -> 16, int8/fp8 -> 32.
    sub = {4: 8, 2: 16, 1: 32}.get(itemsize, 8)

    budget, vmem_limit, row_cap = _vmem_plan()
    # Per-row VMEM footprint: double-buffered in/out blocks (native dtype) plus
    # in-kernel f32 working values (x_f32, acc, one shifted temp).
    bytes_per_row = 2 * (l + l_out) * itemsize + (l + 2 * l_out) * 4
    cap_rows = max(sub, min(budget // bytes_per_row, row_cap))

    if cap_rows >= r:
        # Whole problem fits in one block.  Prefer >=2 grid steps so both v7x
        # TensorCores get work (near-free on single-TC v5e/v6e), when the split
        # tiles stay sublane-aligned.
        half = _round_up(pl.cdiv(r, 2), sub)
        tr = half if (r >= 2 * sub and half < r) else r
    else:
        tr = max(sub, (cap_rows // sub) * sub)

    grid = (pl.cdiv(r, tr),)
    use_roll = (l % _LANE == 0)

    kernel = partial(
        _smooth_rows_kernel,
        taps=tuple(float(t) for t in taps),
        l_out=l_out,
        use_roll=use_roll,
    )

    cost = pl.CostEstimate(
        flops=2 * k * r * l_out,
        transcendentals=0,
        bytes_accessed=itemsize * (r * l + r * l_out),
    )

    out = pl.pallas_call(
        kernel,
        out_shape=jax.ShapeDtypeStruct((r, l_out), x.dtype),
        grid=grid,
        in_specs=[pl.BlockSpec((tr, l), lambda i: (i, 0))],
        out_specs=pl.BlockSpec((tr, l_out), lambda i: (i, 0)),
        compiler_params=pltpu.CompilerParams(
            dimension_semantics=("parallel",),
            vmem_limit_bytes=vmem_limit,
        ),
        cost_estimate=cost,
    )(xr)

    return out.reshape(n, c, l_out)


def _reference(x, taps):
    """Pure-JAX reference: depthwise conv1d, valid padding."""
    n, c, l = x.shape
    k = len(taps)
    l_out = l - k + 1
    out = jnp.zeros((n, c, l_out), dtype=jnp.float32)
    for kk in range(k):
        out = out + x[:, :, kk:kk + l_out].astype(jnp.float32) * float(taps[kk])
    return out.astype(x.dtype)


if __name__ == "__main__":
    # Small shapes consistent with the module's forward (conv1d, NCW).
    batch, channels, length = 2, 4, 16
    kernel_size, sigma = 5, 1.0

    key = jax.random.PRNGKey(0)
    x = jax.random.normal(key, (batch, channels, length), dtype=jnp.float32)
    taps = gaussian_taps(kernel_size, sigma)  # identical per channel, as in the module

    out = gaussian_smoothing_1d(x, taps)
    out = jax.block_until_ready(out)

    ref = _reference(x, taps)
    np.testing.assert_allclose(np.asarray(out), np.asarray(ref), rtol=1e-5, atol=1e-5)

    print("KERNEL_OK")
</pallas_src>

<mosaic_0001>
module attributes {stable_mosaic.version = 11 : i64} {
  func.func @_smooth_rows_kernel(%arg0: i32, %arg1: memref<8x16xf32, #tpu.memory_space<vmem>>, %arg2: memref<8x12xf32, #tpu.memory_space<vmem>>) attributes {dimension_semantics = [#tpu.dimension_semantics<parallel>], iteration_bounds = array<i64: 1>, scalar_prefetch = 0 : i64, scratch_operands = 0 : i64, tpu.core_type = #tpu.core_type<tc>, window_params = [{transform_indices = @transform_0, window_bounds = array<i64: 8, 16>}, {transform_indices = @transform_1, window_bounds = array<i64: 8, 12>}]} {
    %c0 = arith.constant 0 : index
    %c0_0 = arith.constant 0 : index
    %0 = vector.load %arg1[%c0, %c0_0] : memref<8x16xf32, #tpu.memory_space<vmem>>, vector<8x16xf32>
    %1 = vector.extract_strided_slice %0 {offsets = [0, 0], sizes = [8, 12], strides = [1, 1]} : vector<8x16xf32> to vector<8x12xf32>
    %cst = arith.constant 0.054488685 : f32
    %2 = vector.broadcast %cst : f32 to vector<8x12xf32>
    %3 = arith.mulf %1, %2 : vector<8x12xf32>
    %4 = vector.extract_strided_slice %0 {offsets = [0, 1], sizes = [8, 12], strides = [1, 1]} : vector<8x16xf32> to vector<8x12xf32>
    %cst_1 = arith.constant 0.244201347 : f32
    %5 = vector.broadcast %cst_1 : f32 to vector<8x12xf32>
    %6 = arith.mulf %4, %5 : vector<8x12xf32>
    %7 = arith.addf %3, %6 : vector<8x12xf32>
    %8 = vector.extract_strided_slice %0 {offsets = [0, 2], sizes = [8, 12], strides = [1, 1]} : vector<8x16xf32> to vector<8x12xf32>
    %cst_2 = arith.constant 0.402619958 : f32
    %9 = vector.broadcast %cst_2 : f32 to vector<8x12xf32>
    %10 = arith.mulf %8, %9 : vector<8x12xf32>
    %11 = arith.addf %7, %10 : vector<8x12xf32>
    %12 = vector.extract_strided_slice %0 {offsets = [0, 3], sizes = [8, 12], strides = [1, 1]} : vector<8x16xf32> to vector<8x12xf32>
    %cst_3 = arith.constant 0.244201347 : f32
    %13 = vector.broadcast %cst_3 : f32 to vector<8x12xf32>
    %14 = arith.mulf %12, %13 : vector<8x12xf32>
    %15 = arith.addf %11, %14 : vector<8x12xf32>
    %16 = vector.extract_strided_slice %0 {offsets = [0, 4], sizes = [8, 12], strides = [1, 1]} : vector<8x16xf32> to vector<8x12xf32>
    %cst_4 = arith.constant 0.054488685 : f32
    %17 = vector.broadcast %cst_4 : f32 to vector<8x12xf32>
    %18 = arith.mulf %16, %17 : vector<8x12xf32>
    %19 = arith.addf %15, %18 : vector<8x12xf32>
    %c0_5 = arith.constant 0 : index
    %c0_6 = arith.constant 0 : index
    %20 = vector.load %arg2[%c0_5, %c0_6] : memref<8x12xf32, #tpu.memory_space<vmem>>, vector<8x12xf32>
    tpu.vector_store %arg2[%c0_5, %c0_6], %19 {strides = array<i32>} : memref<8x12xf32, #tpu.memory_space<vmem>>, vector<8x12xf32>,
    return
  }
  func.func @transform_0(%arg0: i32) -> (i32, i32) {
    %c0_i32 = arith.constant 0 : i32
    %c0_i32_0 = arith.constant 0 : i32
    return %arg0, %c0_i32 : i32, i32
  }
  func.func @transform_1(%arg0: i32) -> (i32, i32) {
    %c0_i32 = arith.constant 0 : i32
    %c0_i32_0 = arith.constant 0 : i32
    return %arg0, %c0_i32 : i32, i32
  }
}

</mosaic_0001>

<bundles_post_ra>
// kernel: tpu_custom_call.1
= control target key start
LH: loop header
LB: loop body
LE: loop exit
PB: predicated region body
PF: predicated region fallthrough
CT: control target
= control target key end

     0   :  { %6 = vsyncpa [#allocation3], 0  ;;  %s145_s0 = inlined_call_operand.hbm [shape: f32[8,16], index: 0, kind: input, shape index: {}]   ;;  %s146_s1 = inlined_call_operand.hbm [shape: f32[8,12], index: 1, kind: output, shape index: {}]  }
   0x1   :  { %7 = vsyncpa [#allocation4], 0  ;;  %s13_s8 = sshll.u32 %s145_s0, 4  ;;  %s123_s9 = smov [#allocation2]   ;;  %s14_s8 = int_to_ptr.hbm [resolvable:$true] %s13_s8 }
   0x2   :  { %s15_s10 = sshll.u32 %s123_s9, 4  ;;  %s16_s10 = int_to_ptr.vmem [resolvable:$true] %s15_s10 }
   0x3   :  { %18 = dma.hbm_to_vmem [thread:$0]  %s14_s8, 128, %s16_s10, [#allocation3]  }
   0x4   :  { %119 = dma.done.wait [#allocation3], 128  }
   0x5   :  { %120 = vsyncadd [#allocation3], 4294967168  ;;  %v23_v0 = vld [vmem:[#allocation2] sm:$0xff]  ;;  %s124_s11 = smov 127   ;;  %s125_s12 = smov 125   ;;  %vm46_vm0 = vcmask 97280  }
   0x6   :  { %v25_v1 = vmul.f32 0.24420135, %v23_v0  ;;  %v31_v2 = vmul.f32 0.40261996, %v23_v0  ;;  %v24_v3 = vmul.f32 0.054488685, %v23_v0 }
   0x7   :  { %s126_s13 = smov 126   ;;  %s127_s14 = smov 124  }
   0x8   :  { %27 = vrot.lane.b32.xlu0 %v25_v1, %s124_s11  ;;  %37 = vrot.lane.b32.xlu1 %v25_v1, %s125_s12  ;;  %s128_s0 = smov [#allocation5]   ;;  %s55_s18 = sshll.u32 %s146_s1, 4  ;;  %s56_s18 = int_to_ptr.hbm [resolvable:$true] %s55_s18 }
   0x9   :  { %s53_s15 = sshll.u32 %s128_s0, 4  ;;  %s54_s15 = int_to_ptr.vmem [resolvable:$true] %s53_s15 }
  0x10   :  { %33 = vrot.lane.b32.xlu0 %v31_v2, %s126_s13  ;;  %42 = vrot.lane.b32.xlu1 %v24_v3, %s127_s14 }
  0x7a   :  { %v28_v4 = vpop.permute.xlu0 %27  ;;  %v38_v5 = vpop.permute.xlu1 %37 }
  0x7b   :  { %v30_v6 = vadd.f32 %v28_v4, %v24_v3 }
  0x82   :  { %v34_v7 = vpop.permute.xlu0 %33  ;;  %v43_v9 = vpop.permute.xlu1 %42 }
  0x83   :  { %v36_v8 = vadd.f32 %v34_v7, %v30_v6 }
  0x85   :  { %v40_v10 = vadd.f32 %v38_v5, %v36_v8 }
  0x87   :  { %v45_v11 = vadd.f32 %v43_v9, %v40_v10 }
  0x89   :  { %47 = vst.msk [vmem:[#allocation5] sm:$0xff] %vm46_vm0, %v45_v11 }
  0x8a   :  { %58 = dma.vmem_to_hbm [thread:$0]  %s54_s15, 128, %s56_s18, [#allocation4]  }
  0x8b   :  { %121 = dma.done.wait [#allocation4], 128  }
  0x8c   :  { %122 = vsyncadd [#allocation4], 4294967168 }
  0x8d   :  { %63 = vsyncpa [#allocation3], 1 }
  0x8e   :  { %64 = vsyncpa [#allocation4], 1 }

</bundles_post_ra>
